<compile_context>
chip_gen: v6e
topology: v6e:2x2x1
jax: 0.10.0
libtpu: 0.0.40
codegen_flags: <defaults>
</compile_context>

<pallas_src>
import functools
from typing import NamedTuple

import jax
import jax.numpy as jnp
from jax.experimental import pallas as pl
from jax.experimental.pallas import tpu as pltpu


PACK = 8          # batch samples packed per lane-dense row (8 * f32 lanes)
ROW_ALIGN = 8     # sublane alignment for the packed-row (M) dimension


def _round_up(x, m):
    return ((x + m - 1) // m) * m


class MultiVariateParams(NamedTuple):
    """Packed parameters. Build ONCE with prepare_params(); reuse every forward."""
    w1_bd: jax.Array     # (PACK*S, PACK*S)    block-diag fc1 weight
    wh_bd: jax.Array     # (PACK*S, PACK*2A)   block-diag fused [mean | log_std] weight
    b_packed: jax.Array  # (2, Wb)  row0 = tiled fc1 bias, row1 = tiled [bm | bs]
    state_dim: int
    action_dim: int


def prepare_params(w1, b1, wm, bm, ws, bs):
    """Hoisted (one-time) packing: fuse heads, block-diagonalise, tile biases."""
    S = w1.shape[0]
    A = wm.shape[1]
    eye = jnp.eye(PACK, dtype=w1.dtype)
    wh = jnp.concatenate([wm, ws], axis=1)                      # (S, 2A)
    w1_bd = jnp.kron(eye, w1)                                   # (8S, 8S)
    wh_bd = jnp.kron(eye, wh)                                   # (8S, 16A)
    b1_t = jnp.tile(b1.reshape(1, S), (1, PACK))                # (1, 8S)
    bh_t = jnp.tile(jnp.concatenate([bm.reshape(1, A), bs.reshape(1, A)], axis=1),
                    (1, PACK))                                  # (1, 16A)
    Wb = max(PACK * S, PACK * 2 * A)
    b_packed = jnp.concatenate(
        [jnp.pad(b1_t, ((0, 0), (0, Wb - PACK * S))),
         jnp.pad(bh_t, ((0, 0), (0, Wb - PACK * 2 * A)))],
        axis=0,
    )                                                           # (2, Wb)
    return MultiVariateParams(w1_bd, wh_bd, b_packed, S, A)


def _multivariate_kernel(state_ref, w1_ref, wh_ref, b_ref, out_ref, *, S, A):
    Sp = PACK * S          # packed hidden width  (lanes)
    Op = PACK * 2 * A      # packed output width  (lanes)

    b1 = b_ref[0:1, :Sp]   # (1, Sp) static lane-aligned slice
    bh = b_ref[1:2, :Op]   # (1, Op)

    # fc1 + ReLU (block-diagonal weight -> each 8-sample packed row stays independent)
    x = jnp.dot(state_ref[...], w1_ref[...], preferred_element_type=jnp.float32)
    x = jnp.maximum(x + b1, 0.0)

    # Fused heads: one matmul yields [mean_j | log_std_j] per packed sample j.
    y = jnp.dot(x, wh_ref[...], preferred_element_type=jnp.float32) + bh

    # clamp+exp only on the std lanes; mask is a tiny (1, Op) iota (1 vreg).
    lane = jax.lax.broadcasted_iota(jnp.int32, (1, Op), 1)
    is_std = (lane % (2 * A)) >= A
    std_all = jnp.exp(jnp.clip(y, -20.0, 2.0))    # EUP-slot work; bounded -> no inf/NaN
    out_ref[...] = jnp.where(is_std, std_all, y).astype(out_ref.dtype)


def multivariate_forward(state, params: MultiVariateParams, *, block_b=4096):
    """state: (B, S) f32.  Returns (mean, std), each (B, A) f32."""
    B, S = state.shape
    assert S == params.state_dim, "state width mismatch"
    A = params.action_dim
    Sp = PACK * S
    Op = PACK * 2 * A

    # Batch tiling: PACK samples per row, rows tiled over the grid.
    rows_needed = pl.cdiv(B, PACK)
    block_rows = max(ROW_ALIGN,
                     min(block_b // PACK, _round_up(rows_needed, ROW_ALIGN)))
    block_rows = _round_up(block_rows, ROW_ALIGN)
    rows = _round_up(rows_needed, block_rows)
    Bp = rows * PACK

    if Bp != B:
        state = jnp.pad(state, ((0, Bp - B), (0, 0)))   # only for ragged batches
    state_packed = state.reshape(rows, Sp)              # free row-major repack

    grid = (rows // block_rows,)

    cost = pl.CostEstimate(
        flops=2 * rows * Sp * Sp + 2 * rows * Sp * Op,
        transcendentals=rows * Op,
        bytes_accessed=4 * (rows * Sp + rows * Op + Sp * Sp + Sp * Op
                            + 2 * int(params.b_packed.shape[1])),
    )

    out = pl.pallas_call(
        functools.partial(_multivariate_kernel, S=S, A=A),
        out_shape=jax.ShapeDtypeStruct((rows, Op), jnp.float32),
        grid_spec=pltpu.PrefetchScalarGridSpec(
            num_scalar_prefetch=0,
            grid=grid,
            in_specs=[
                pl.BlockSpec((block_rows, Sp), lambda i: (i, 0)),   # packed state tile
                pl.BlockSpec((Sp, Sp), lambda i: (0, 0)),           # fc1 weight (resident)
                pl.BlockSpec((Sp, Op), lambda i: (0, 0)),           # fused head weight (resident)
                pl.BlockSpec(params.b_packed.shape, lambda i: (0, 0)),  # packed biases (resident)
            ],
            out_specs=pl.BlockSpec((block_rows, Op), lambda i: (i, 0)),
        ),
        compiler_params=pltpu.CompilerParams(
            dimension_semantics=("parallel",)),
        cost_estimate=cost,
    )(state_packed, params.w1_bd, params.wh_bd, params.b_packed)

    flat = out.reshape(Bp, 2 * A)[:B]     # free reshape back + drop padding
    return flat[:, :A], flat[:, A:]


def _torch_linear_init(key, fan_in, fan_out):
    """PyTorch-style uniform(-1/sqrt(fan_in), 1/sqrt(fan_in)).
    Weight in (in, out) layout, bias (1, out)."""
    kw, kb = jax.random.split(key)
    bound = 1.0 / jnp.sqrt(jnp.float32(fan_in))
    w = jax.random.uniform(kw, (fan_in, fan_out), jnp.float32, -bound, bound)
    b = jax.random.uniform(kb, (1, fan_out), jnp.float32, -bound, bound)
    return w, b


if __name__ == "__main__":
    state_dim = 32          # hidden_dim == state_dim per module __init__
    action_dim = 8
    batch = 8

    key = jax.random.PRNGKey(0)
    k_state, k_fc1, k_mean, k_logstd = jax.random.split(key, 4)

    state = jax.random.normal(k_state, (batch, state_dim), jnp.float32)
    w1, b1 = _torch_linear_init(k_fc1, state_dim, state_dim)
    wm, bm = _torch_linear_init(k_mean, state_dim, action_dim)
    ws, bs = _torch_linear_init(k_logstd, state_dim, action_dim)

    params = prepare_params(w1, b1, wm, bm, ws, bs)   # packing hoisted out of hot path

    def ref_forward(st):
        x = jnp.maximum(st @ w1 + b1, 0.0)
        return x @ wm + bm, jnp.exp(jnp.clip(x @ ws + bs, -20.0, 2.0))

    # Small-batch path (single tile).
    mean, std = multivariate_forward(state, params)
    jax.block_until_ready((mean, std))
    mean_ref, std_ref = ref_forward(state)
    assert mean.shape == (batch, action_dim) and std.shape == (batch, action_dim)
    assert jnp.allclose(mean, mean_ref, atol=1e-4, rtol=1e-4)
    assert jnp.allclose(std, std_ref, atol=1e-4, rtol=1e-4)

    # Multi-tile grid path (grid=(4,)) — exercises pipelining / TC sharding.
    big_B = 1024
    big_state = jax.random.normal(jax.random.PRNGKey(1), (big_B, state_dim), jnp.float32)
    bmean, bstd = multivariate_forward(big_state, params, block_b=256)
    jax.block_until_ready((bmean, bstd))
    rmean, rstd = ref_forward(big_state)
    assert jnp.allclose(bmean, rmean, atol=1e-4, rtol=1e-4)
    assert jnp.allclose(bstd, rstd, atol=1e-4, rtol=1e-4)

    # Ragged batch — exercises the padding path.
    odd_B = 50
    odd_state = jax.random.normal(jax.random.PRNGKey(2), (odd_B, state_dim), jnp.float32)
    omean, ostd = multivariate_forward(odd_state, params)
    jax.block_until_ready((omean, ostd))
    rmean, rstd = ref_forward(odd_state)
    assert omean.shape == (odd_B, action_dim)
    assert jnp.allclose(omean, rmean, atol=1e-4, rtol=1e-4)
    assert jnp.allclose(ostd, rstd, atol=1e-4, rtol=1e-4)

    # TODO(synk): sample()/evaluate_action() (MultivariateNormal rsample/log_prob/entropy)
    # are not part of forward() and are left out of the kernel.

    print("KERNEL_OK")
</pallas_src>

<mosaic_0001>
module attributes {stable_mosaic.version = 11 : i64} {
  func.func @_multivariate_kernel(%arg0: i32, %arg1: memref<8x256xf32, #tpu.memory_space<vmem>>, %arg2: memref<256x256xf32, #tpu.memory_space<vmem>>, %arg3: memref<256x128xf32, #tpu.memory_space<vmem>>, %arg4: memref<2x256xf32, #tpu.memory_space<vmem>>, %arg5: memref<8x128xf32, #tpu.memory_space<vmem>>) attributes {dimension_semantics = [#tpu.dimension_semantics<parallel>], iteration_bounds = array<i64: 1>, scalar_prefetch = 0 : i64, scratch_operands = 0 : i64, tpu.core_type = #tpu.core_type<tc>, window_params = [{transform_indices = @transform_0, window_bounds = array<i64: 8, 256>}, {pipeline_mode = #tpu.pipeline_mode<synchronous>, transform_indices = @transform_1, window_bounds = array<i64: 256, 256>}, {pipeline_mode = #tpu.pipeline_mode<synchronous>, transform_indices = @transform_2, window_bounds = array<i64: 256, 128>}, {pipeline_mode = #tpu.pipeline_mode<synchronous>, transform_indices = @transform_3, window_bounds = array<i64: 2, 256>}, {transform_indices = @transform_4, window_bounds = array<i64: 8, 128>}]} {
    %c0 = arith.constant 0 : index
    %c0_0 = arith.constant 0 : index
    %0 = vector.load %arg4[%c0, %c0_0] : memref<2x256xf32, #tpu.memory_space<vmem>>, vector<1x256xf32>
    %c1 = arith.constant 1 : index
    %c0_1 = arith.constant 0 : index
    %1 = vector.load %arg4[%c1, %c0_1] : memref<2x256xf32, #tpu.memory_space<vmem>>, vector<1x128xf32>
    %c0_2 = arith.constant 0 : index
    %c0_3 = arith.constant 0 : index
    %2 = vector.load %arg1[%c0_2, %c0_3] : memref<8x256xf32, #tpu.memory_space<vmem>>, vector<8x256xf32>
    %c0_4 = arith.constant 0 : index
    %c0_5 = arith.constant 0 : index
    %3 = vector.load %arg2[%c0_4, %c0_5] : memref<256x256xf32, #tpu.memory_space<vmem>>, vector<256x256xf32>
    %cst = arith.constant dense<0.000000e+00> : vector<8x256xf32>
    %4 = tpu.matmul %2, %3, %cst {dimension_numbers = #tpu.dot_dimension_numbers<[1], [0], [0], [1], [0, 0, 1, 1], [], []>} : vector<8x256xf32>, vector<256x256xf32>, vector<8x256xf32> -> vector<8x256xf32>
    %5 = vector.broadcast %0 : vector<1x256xf32> to vector<8x256xf32>
    %6 = arith.addf %4, %5 : vector<8x256xf32>
    %cst_6 = arith.constant 0.000000e+00 : f32
    %7 = vector.broadcast %cst_6 : f32 to vector<8x256xf32>
    %8 = arith.maximumf %6, %7 : vector<8x256xf32>
    %c0_7 = arith.constant 0 : index
    %c0_8 = arith.constant 0 : index
    %9 = vector.load %arg3[%c0_7, %c0_8] : memref<256x128xf32, #tpu.memory_space<vmem>>, vector<256x128xf32>
    %cst_9 = arith.constant dense<0.000000e+00> : vector<8x128xf32>
    %10 = tpu.matmul %8, %9, %cst_9 {dimension_numbers = #tpu.dot_dimension_numbers<[1], [0], [0], [1], [0, 0, 1, 1], [], []>} : vector<8x256xf32>, vector<256x128xf32>, vector<8x128xf32> -> vector<8x128xf32>
    %11 = vector.broadcast %1 : vector<1x128xf32> to vector<8x128xf32>
    %12 = arith.addf %10, %11 : vector<8x128xf32>
    %13 = tpu.iota {dimensions = array<i32: 1>} : vector<1x128xi32>
    %c16_i32 = arith.constant 16 : i32
    %c0_i32 = arith.constant 0 : i32
    %14 = arith.cmpi eq, %c16_i32, %c0_i32 : i32
    %c1_i32 = arith.constant 1 : i32
    %15 = arith.select %14, %c1_i32, %c16_i32 : i32
    %16 = vector.broadcast %15 : i32 to vector<1x128xi32>
    %17 = arith.remsi %13, %16 : vector<1x128xi32>
    %c0_i32_10 = arith.constant 0 : i32
    %18 = vector.broadcast %c0_i32_10 : i32 to vector<1x128xi32>
    %19 = arith.cmpi ne, %17, %18 : vector<1x128xi32>
    %c0_i32_11 = arith.constant 0 : i32
    %20 = vector.broadcast %c0_i32_11 : i32 to vector<1x128xi32>
    %21 = arith.cmpi slt, %17, %20 : vector<1x128xi32>
    %c0_i32_12 = arith.constant 0 : i32
    %22 = arith.cmpi slt, %15, %c0_i32_12 : i32
    %23 = vector.broadcast %22 : i1 to vector<1x128xi1>
    %24 = vector.broadcast %23 : vector<1x128xi1> to vector<1x128xi1>
    %25 = arith.xori %21, %24 : vector<1x128xi1>
    %26 = arith.andi %25, %19 : vector<1x128xi1>
    %27 = vector.broadcast %15 : i32 to vector<1x128xi32>
    %28 = arith.addi %17, %27 : vector<1x128xi32>
    %29 = arith.select %26, %28, %17 : vector<1x128xi1>, vector<1x128xi32>
    %c8_i32 = arith.constant 8 : i32
    %30 = vector.broadcast %c8_i32 : i32 to vector<1x128xi32>
    %31 = arith.cmpi sge, %29, %30 : vector<1x128xi32>
    %cst_13 = arith.constant -2.000000e+01 : f32
    %cst_14 = arith.constant 2.000000e+00 : f32
    %32 = vector.broadcast %cst_13 : f32 to vector<8x128xf32>
    %33 = arith.maximumf %32, %12 : vector<8x128xf32>
    %34 = vector.broadcast %cst_14 : f32 to vector<8x128xf32>
    %35 = arith.minimumf %34, %33 : vector<8x128xf32>
    %36 = math.exp %35 : vector<8x128xf32>
    %37 = vector.shape_cast %31 : vector<1x128xi1> to vector<1x128xi1>
    %38 = vector.broadcast %37 : vector<1x128xi1> to vector<8x128xi1>
    %39 = arith.select %38, %36, %12 : vector<8x128xi1>, vector<8x128xf32>
    %c0_15 = arith.constant 0 : index
    %c0_16 = arith.constant 0 : index
    %40 = vector.load %arg5[%c0_15, %c0_16] : memref<8x128xf32, #tpu.memory_space<vmem>>, vector<8x128xf32>
    tpu.vector_store %arg5[%c0_15, %c0_16], %39 {strides = array<i32>} : memref<8x128xf32, #tpu.memory_space<vmem>>, vector<8x128xf32>,
    return
  }
  func.func @transform_0(%arg0: i32) -> (i32, i32) {
    %c0_i32 = arith.constant 0 : i32
    %c0_i32_0 = arith.constant 0 : i32
    return %arg0, %c0_i32 : i32, i32
  }
  func.func @transform_1(%arg0: i32) -> (i32, i32) {
    %c0_i32 = arith.constant 0 : i32
    %c0_i32_0 = arith.constant 0 : i32
    %c0_i32_1 = arith.constant 0 : i32
    return %c0_i32, %c0_i32_0 : i32, i32
  }
  func.func @transform_2(%arg0: i32) -> (i32, i32) {
    %c0_i32 = arith.constant 0 : i32
    %c0_i32_0 = arith.constant 0 : i32
    %c0_i32_1 = arith.constant 0 : i32
    return %c0_i32, %c0_i32_0 : i32, i32
  }
  func.func @transform_3(%arg0: i32) -> (i32, i32) {
    %c0_i32 = arith.constant 0 : i32
    %c0_i32_0 = arith.constant 0 : i32
    %c0_i32_1 = arith.constant 0 : i32
    return %c0_i32, %c0_i32_0 : i32, i32
  }
  func.func @transform_4(%arg0: i32) -> (i32, i32) {
    %c0_i32 = arith.constant 0 : i32
    %c0_i32_0 = arith.constant 0 : i32
    return %arg0, %c0_i32 : i32, i32
  }
}

</mosaic_0001>

<bundles_post_ra>
// kernel: tpu_custom_call.1
= control target key start
LH: loop header
LB: loop body
LE: loop exit
PB: predicated region body
PF: predicated region fallthrough
CT: control target
= control target key end

     0   :  { %9 = vsyncpa [#allocation3], 0  ;;  %s537_s0 = inlined_call_operand.hbm [shape: f32[8,256], index: 0, kind: input, shape index: {}]   ;;  %s538_s1 = inlined_call_operand.hbm [shape: f32[256,256], index: 1, kind: input, shape index: {}]   ;;  %s539_s2 = inlined_call_operand.hbm [shape: f32[256,128], index: 2, kind: input, shape index: {}]   ;;  %s540_s3 = inlined_call_operand.vmem [shape: f32[2,256], index: 3, kind: input, shape index: {}]   ;;  %s541_s4 = inlined_call_operand.hbm [shape: f32[8,128], index: 4, kind: output, shape index: {}]  }
   0x1   :  { %10 = vsyncpa [#allocation6], 0 }
   0x2   :  { %11 = vsyncpa [#allocation4], 0  ;;  %s486_s15 = smov [#allocation5]  }
   0x3   :  { %s27_s16 = sshll.u32 %s486_s15, 4  ;;  %s28_s16 = int_to_ptr.vmem [resolvable:$true] %s27_s16 }
   0x4   :  { %s408_s17 = scalar_lea.vmem %s28_s16, 8192  ;;  %p413_p1 = scmp.lt.s32.totalorder %s28_s16, %s28_s16 }
   0x5   :  { %p409_p0 = scmp.ne.s32.totalorder %s28_s16, %s408_s17  ;;  %p414_p2 = scmp.lt.s32.totalorder %s408_s17, %s408_s17 }
   0x7   :  { %p415_p3 = por %p414_p2, %p413_p1 }
   0x9   :  { %p416_p4 = pnand %p415_p3, %p409_p0 }
   0xb   :  { %419 = shalt.err (!%p416_p4)
}
   0xc   :  { %s487_s18 = smov 256   ;;  %s488_s19 = smov 16  }
   0xd   :  { %33 = dma.hbm_to_vmem [thread:$0]  %s538_s1, 8192, %s28_s16, [#allocation6], %s487_s18, %s487_s18, %s488_s19  }
   0xe   :  { %s489_s22 = smov [#allocation2]   ;;  %s490_s24 = smov [#allocation7]  }
   0xf   :  { %s18_s23 = sshll.u32 %s489_s22, 4  ;;  %s39_s25 = sshll.u32 %s490_s24, 4  ;;  %s19_s23 = int_to_ptr.vmem [resolvable:$true] %s18_s23  ;;  %s40_s25 = int_to_ptr.vmem [resolvable:$true] %s39_s25 }
  0x10   :  { %s428_s26 = scalar_lea.vmem %s19_s23, 256  ;;  %p433_p6 = scmp.lt.s32.totalorder %s19_s23, %s19_s23 }
  0x11   :  { %p429_p5 = scmp.ne.s32.totalorder %s19_s23, %s428_s26  ;;  %p434_p7 = scmp.lt.s32.totalorder %s428_s26, %s428_s26 }
  0x13   :  { %p435_p8 = por %p434_p7, %p433_p6 }
  0x15   :  { %p436_p9 = pnand %p435_p8, %p429_p5 }
  0x17   :  { %439 = shalt.err (!%p436_p9)
}
  0x18   :  { %21 = dma.hbm_to_vmem [thread:$0]  %s537_s0, 256, %s19_s23, [#allocation3]  }
  0x19   :  { %s448_s29 = scalar_lea.vmem %s40_s25, 4096  ;;  %p453_p11 = scmp.lt.s32.totalorder %s40_s25, %s40_s25 }
  0x1a   :  { %p449_p10 = scmp.ne.s32.totalorder %s40_s25, %s448_s29  ;;  %p454_p12 = scmp.lt.s32.totalorder %s448_s29, %s448_s29 }
  0x1c   :  { %p455_p13 = por %p454_p12, %p453_p11 }
  0x1e   :  { %p456_p0 = pnand %p455_p13, %p449_p10 }
  0x20   :  { %459 = shalt.err (!%p456_p0)
}
  0x21   :  { %s491_s1 = smov 128   ;;  %s492_s30 = smov 8  }
  0x22   :  { %45 = dma.hbm_to_vmem [thread:$0]  %s539_s2, 4096, %s40_s25, [#allocation6], %s491_s1, %s491_s1, %s492_s30  }
  0x23   :  { %480 = dma.done.wait [#allocation3], 256  }
  0x24   :  { %481 = vsyncadd [#allocation3], 4294967040 }
  0x25   :  { %482 = dma.done.wait [#allocation6], 12288  }
  0x26   :  { %483 = vsyncadd [#allocation6], 4294955008  ;;  %v92_v0 = vld [vmem:[#allocation5 + $0xf8] sm:$0xff]  ;;  %v91_v1 = vld [vmem:[#allocation5 + $0xf0] sm:$0xff]  ;;  %s493_s9 = smov [#allocation8]  }
  0x27   :  { %v90_v2 = vld [vmem:[#allocation5 + $0xe8] sm:$0xff]  ;;  %136 = vmatprep.subr.mxu0 %v92_v0  ;;  %v89_v3 = vld [vmem:[#allocation5 + $0xe0] sm:$0xff]  ;;  %v88_v4 = vld [vmem:[#allocation5 + $0xd8] sm:$0xff]  ;;  %s344_s10 = sshll.u32 %s493_s9, 4  ;;  %s345_s10 = int_to_ptr.vmem [resolvable:$true] %s344_s10 }
  0x28   :  { %137 = vmatpush1.msra.mxu0 %v91_v1  ;;  %v87_v5 = vld [vmem:[#allocation5 + $0xd0] sm:$0xff]  ;;  %v86_v6 = vld [vmem:[#allocation5 + $0xc8] sm:$0xff]  ;;  %v85_v7 = vld [vmem:[#allocation5 + $0xc0] sm:$0xff]  ;;  %s460_s11 = scalar_lea.vmem %s345_s10, 128  ;;  %p465_p2 = scmp.lt.s32.totalorder %s345_s10, %s345_s10 }
  0x29   :  { %138 = vmatprep.subr.mxu0 %v90_v2  ;;  %v84_v8 = vld [vmem:[#allocation5 + $0xb8] sm:$0xff]  ;;  %v83_v9 = vld [vmem:[#allocation5 + $0xb0] sm:$0xff]  ;;  %v82_v10 = vld [vmem:[#allocation5 + $0xa8] sm:$0xff]  ;;  %p461_p1 = scmp.ne.s32.totalorder %s345_s10, %s460_s11  ;;  %p466_p3 = scmp.lt.s32.totalorder %s460_s11, %s460_s11 }
  0x2a   :  { %139 = vmatpush1.msra.mxu0 %v89_v3  ;;  %v81_v11 = vld [vmem:[#allocation5 + $0xa0] sm:$0xff]  ;;  %v80_v12 = vld [vmem:[#allocation5 + $0x98] sm:$0xff]  ;;  %v79_v13 = vld [vmem:[#allocation5 + $0x90] sm:$0xff] }
  0x2b   :  { %140 = vmatprep.subr.mxu0 %v88_v4  ;;  %v78_v14 = vld [vmem:[#allocation5 + $0x88] sm:$0xff]  ;;  %v77_v15 = vld [vmem:[#allocation5 + $0x80] sm:$0xff]  ;;  %v76_v16 = vld [vmem:[#allocation5 + $0x78] sm:$0xff]  ;;  %p467_p4 = por %p466_p3, %p465_p2 }
  0x2c   :  { %141 = vmatpush1.msra.mxu0 %v87_v5  ;;  %v75_v17 = vld [vmem:[#allocation5 + $0x70] sm:$0xff]  ;;  %v74_v18 = vld [vmem:[#allocation5 + $0x68] sm:$0xff]  ;;  %v73_v19 = vld [vmem:[#allocation5 + $0x60] sm:$0xff] }
  0x2d   :  { %142 = vmatprep.subr.mxu0 %v86_v6  ;;  %v72_v20 = vld [vmem:[#allocation5 + $0x58] sm:$0xff]  ;;  %v71_v21 = vld [vmem:[#allocation5 + $0x50] sm:$0xff]  ;;  %v70_v22 = vld [vmem:[#allocation5 + $0x48] sm:$0xff]  ;;  %p468_p5 = pnand %p467_p4, %p461_p1 }
  0x2e   :  { %143 = vmatpush1.msra.mxu0 %v85_v7  ;;  %v69_v23 = vld [vmem:[#allocation5 + $0x40] sm:$0xff]  ;;  %v68_v24 = vld [vmem:[#allocation5 + $0x38] sm:$0xff]  ;;  %v239_v28 = vld [vmem:[#allocation7 + $0xf0] sm:$0xff] }
  0x2f   :  { %144 = vmatprep.subr.mxu0 %v84_v8  ;;  %v60_v25 = vld [vmem:[#allocation2 + $0x8] sm:$0xff]  ;;  %v67_v29 = vld [vmem:[#allocation5 + $0x30] sm:$0xff]  ;;  %v66_v31 = vld [vmem:[#allocation5 + $0x28] sm:$0xff] }
  0x30   :  { %145 = vmatpush1.msra.mxu0 %v83_v9  ;;  %200 = vmatprep.mubr.f32.mxu0 %v60_v25  ;;  %v240_v26 = vld [vmem:[#allocation7 + $0xf8] sm:$0xff]  ;;  %v223_v30 = vld [vmem:[#allocation7 + $0x70] sm:$0xff]  ;;  %v238_v32 = vld [vmem:[#allocation7 + $0xe8] sm:$0xff] }
  0x31   :  { %146 = vmatprep.subr.mxu0 %v82_v10  ;;  %v224_v27 = vld [vmem:[#allocation7 + $0x78] sm:$0xff]  ;;  %355 = vmatprep.subr.mxu1 %v240_v26  ;;  %v65_v33 = vld [vmem:[#allocation5 + $0x20] sm:$0xff]  ;;  %v222_v34 = vld [vmem:[#allocation7 + $0x68] sm:$0xff] }
  0x32   :  { %147 = vmatpush1.msra.mxu0 %v81_v11  ;;  %356 = vmatpush3.msra.mxu1 %v224_v27  ;;  %v64_v35 = vld [vmem:[#allocation5 + $0x18] sm:$0xff]  ;;  %v237_v36 = vld [vmem:[#allocation7 + $0xe0] sm:$0xff]  ;;  %v63_v37 = vld [vmem:[#allocation5 + $0x10] sm:$0xff] }
  0x33   :  { %148 = vmatprep.subr.mxu0 %v80_v12  ;;  %357 = vmatprep.subr.mxu1 %v239_v28  ;;  %v221_v38 = vld [vmem:[#allocation7 + $0x60] sm:$0xff]  ;;  %v62_v39 = vld [vmem:[#allocation5 + $0x8] sm:$0xff]  ;;  %v236_v40 = vld [vmem:[#allocation7 + $0xd8] sm:$0xff] }
  0x34   :  { %149 = vmatpush1.msra.mxu0 %v79_v13  ;;  %358 = vmatpush3.msra.mxu1 %v223_v30  ;;  %v61_v41 = vld [vmem:[#allocation5] sm:$0xff]  ;;  %v220_v42 = vld [vmem:[#allocation7 + $0x58] sm:$0xff]  ;;  %v235_v44 = vld [vmem:[#allocation7 + $0xd0] sm:$0xff] }
  0x35   :  { %150 = vmatprep.subr.mxu0 %v78_v14  ;;  %359 = vmatprep.subr.mxu1 %v238_v32  ;;  %v124_v43 = vld [vmem:[#allocation5 + $0x1f8] sm:$0xff]  ;;  %v123_v45 = vld [vmem:[#allocation5 + $0x1f0] sm:$0xff]  ;;  %v122_v47 = vld [vmem:[#allocation5 + $0x1e8] sm:$0xff] }
  0x36   :  { %151 = vmatpush1.msra.mxu0 %v77_v15  ;;  %360 = vmatpush3.msra.mxu1 %v222_v34  ;;  %v219_v46 = vld [vmem:[#allocation7 + $0x50] sm:$0xff]  ;;  %v234_v48 = vld [vmem:[#allocation7 + $0xc8] sm:$0xff]  ;;  %v121_v49 = vld [vmem:[#allocation5 + $0x1e0] sm:$0xff]  ;;  %v126_v34 = vlaneseq }
  0x37   :  { %152 = vmatprep.subr.mxu0 %v76_v16  ;;  %361 = vmatprep.subr.mxu1 %v237_v36  ;;  %v218_v50 = vld [vmem:[#allocation7 + $0x48] sm:$0xff]  ;;  %v120_v51 = vld [vmem:[#allocation5 + $0x1d8] sm:$0xff]  ;;  %v233_v52 = vld [vmem:[#allocation7 + $0xc0] sm:$0xff] }
  0x38   :  { %153 = vmatpush1.msra.mxu0 %v75_v17  ;;  %362 = vmatpush3.msra.mxu1 %v221_v38  ;;  %v119_v53 = vld [vmem:[#allocation5 + $0x1d0] sm:$0xff]  ;;  %v217_v54 = vld [vmem:[#allocation7 + $0x40] sm:$0xff]  ;;  %v118_v55 = vld [vmem:[#allocation5 + $0x1c8] sm:$0xff] }
  0x39   :  { %154 = vmatprep.subr.mxu0 %v74_v18  ;;  %363 = vmatprep.subr.mxu1 %v236_v40  ;;  %v232_v56 = vld [vmem:[#allocation7 + $0xb8] sm:$0xff]  ;;  %v117_v57 = vld [vmem:[#allocation5 + $0x1c0] sm:$0xff]  ;;  %v231_v60 = vld [vmem:[#allocation7 + $0xb0] sm:$0xff] }
  0x3a   :  { %155 = vmatpush1.msra.mxu0 %v73_v19  ;;  %364 = vmatpush3.msra.mxu1 %v220_v42  ;;  %v216_v58 = vld [vmem:[#allocation7 + $0x38] sm:$0xff]  ;;  %v115_v61 = vld [vmem:[#allocation5 + $0x1b0] sm:$0xff]  ;;  %v114_v63 = vld [vmem:[#allocation5 + $0x1a8] sm:$0xff] }
  0x3b   :  { %156 = vmatprep.subr.mxu0 %v72_v20  ;;  %365 = vmatprep.subr.mxu1 %v235_v44  ;;  %v116_v59 = vld [vmem:[#allocation5 + $0x1b8] sm:$0xff]  ;;  %v215_v62 = vld [vmem:[#allocation7 + $0x30] sm:$0xff]  ;;  %v230_v0 = vld [vmem:[#allocation7 + $0xa8] sm:$0xff] }
  0x3c   :  { %157 = vmatpush1.msra.mxu0 %v71_v21  ;;  %366 = vmatpush3.msra.mxu1 %v219_v46  ;;  %v113_v1 = vld [vmem:[#allocation5 + $0x1a0] sm:$0xff]  ;;  %v214_v2 = vld [vmem:[#allocation7 + $0x28] sm:$0xff]  ;;  %v112_v3 = vld [vmem:[#allocation5 + $0x198] sm:$0xff] }
  0x3d   :  { %158 = vmatprep.subr.mxu0 %v70_v22  ;;  %367 = vmatprep.subr.mxu1 %v234_v48  ;;  %v229_v4 = vld [vmem:[#allocation7 + $0xa0] sm:$0xff]  ;;  %v111_v5 = vld [vmem:[#allocation5 + $0x190] sm:$0xff]  ;;  %v110_v7 = vld [vmem:[#allocation5 + $0x188] sm:$0xff] }
  0x3e   :  { %159 = vmatpush1.msra.mxu0 %v69_v23  ;;  %368 = vmatpush3.msra.mxu1 %v218_v50  ;;  %v213_v6 = vld [vmem:[#allocation7 + $0x20] sm:$0xff]  ;;  %v108_v9 = vld [vmem:[#allocation5 + $0x178] sm:$0xff]  ;;  %v107_v10 = vld [vmem:[#allocation5 + $0x170] sm:$0xff] }
  0x3f   :  { %160 = vmatprep.subr.mxu0 %v68_v24  ;;  %369 = vmatprep.subr.mxu1 %v233_v52  ;;  %v109_v8 = vld [vmem:[#allocation5 + $0x180] sm:$0xff]  ;;  %v106_v11 = vld [vmem:[#allocation5 + $0x168] sm:$0xff]  ;;  %v104_v13 = vld [vmem:[#allocation5 + $0x158] sm:$0xff] }
  0x40   :  { %161 = vmatpush1.msra.mxu0 %v67_v29  ;;  %370 = vmatpush3.msra.mxu1 %v217_v54  ;;  %v105_v12 = vld [vmem:[#allocation5 + $0x160] sm:$0xff]  ;;  %v103_v14 = vld [vmem:[#allocation5 + $0x150] sm:$0xff]  ;;  %v102_v15 = vld [vmem:[#allocation5 + $0x148] sm:$0xff] }
  0x41   :  { %162 = vmatprep.subr.mxu0 %v66_v31  ;;  %371 = vmatprep.subr.mxu1 %v232_v56  ;;  %v101_v16 = vld [vmem:[#allocation5 + $0x140] sm:$0xff]  ;;  %v100_v17 = vld [vmem:[#allocation5 + $0x138] sm:$0xff]  ;;  %v99_v18 = vld [vmem:[#allocation5 + $0x130] sm:$0xff] }
  0x42   :  { %163 = vmatpush1.msra.mxu0 %v65_v33  ;;  %372 = vmatpush3.msra.mxu1 %v216_v58  ;;  %v98_v19 = vld [vmem:[#allocation5 + $0x128] sm:$0xff]  ;;  %v97_v20 = vld [vmem:[#allocation5 + $0x120] sm:$0xff]  ;;  %v96_v21 = vld [vmem:[#allocation5 + $0x118] sm:$0xff] }
  0x43   :  { %164 = vmatprep.subr.mxu0 %v64_v35  ;;  %373 = vmatprep.subr.mxu1 %v231_v60  ;;  %v95_v22 = vld [vmem:[#allocation5 + $0x110] sm:$0xff]  ;;  %v94_v23 = vld [vmem:[#allocation5 + $0x108] sm:$0xff]  ;;  %v93_v24 = vld [vmem:[#allocation5 + $0x100] sm:$0xff]  ;;  %v127_v35 = vshrl.u32 %v126_v34, 7 }
  0x44   :  { %165 = vmatpush1.msra.mxu0 %v63_v37  ;;  %374 = vmatpush3.msra.mxu1 %v215_v62  ;;  %v59_v25 = vld [vmem:[#allocation2] sm:$0xff]  ;;  %v228_v26 = vld [vmem:[#allocation7 + $0x98] sm:$0xff]  ;;  %v226_v30 = vld [vmem:[#allocation7 + $0x88] sm:$0xff] }
  0x45   :  { %166 = vmatprep.subr.mxu0 %v62_v39  ;;  %375 = vmatprep.subr.mxu1 %v230_v0  ;;  %v212_v27 = vld [vmem:[#allocation7 + $0x18] sm:$0xff]  ;;  %v227_v28 = vld [vmem:[#allocation7 + $0x90] sm:$0xff]  ;;  %v210_v31 = vld [vmem:[#allocation7 + $0x8] sm:$0xff]  ;;  %v128_v36 = vsub.s32 0, %v127_v35  ;;  %v132_v38 = vsub.s32 1, %v127_v35 }
  0x46   :  { %167 = vmatpush1.msra.mxu0 %v61_v41  ;;  %376 = vmatpush3.msra.mxu1 %v214_v2  ;;  %v211_v29 = vld [vmem:[#allocation7 + $0x10] sm:$0xff]  ;;  %v225_v32 = vld [vmem:[#allocation7 + $0x80] sm:$0xff] }
  0x47   :  { %168 = vmatprep.subr.mxu0 %v124_v43  ;;  %377 = vmatprep.subr.mxu1 %v229_v4  ;;  %v209_v33 = vld [vmem:[#allocation7] sm:$0xff]  ;;  %v57_v37 = vld [vmem:[%s540_s3] ss:$2 sm:$0x3]  ;;  %v354_v48 = vld [vmem:[%s540_s3 + $0x1] ss:$0 sm:$0xff] }
  0x48   :  { %169 = vmatpush2.msra.mxu0 %v123_v45  ;;  %378 = vmatpush3.msra.mxu1 %v213_v6  ;;  %v129_v39 = vrot.slane %v57_v37, %v128_v36  ;;  %v133_v40 = vrot.slane %v57_v37, %v132_v38 }
  0x49   :  { %170 = vmatprep.subr.mxu0 %v122_v47  ;;  %379 = vmatprep.subr.mxu1 %v228_v26 }
  0x4a   :  { %171 = vmatpush2.msra.mxu0 %v121_v49  ;;  %380 = vmatpush3.msra.mxu1 %v212_v27 }
  0x4b   :  { %172 = vmatprep.subr.mxu0 %v120_v51  ;;  %381 = vmatprep.subr.mxu1 %v227_v28 }
  0x4c   :  { %173 = vmatpush2.msra.mxu0 %v119_v53  ;;  %382 = vmatpush3.msra.mxu1 %v211_v29 }
  0x4d   :  { %174 = vmatprep.subr.mxu0 %v118_v55  ;;  %383 = vmatprep.subr.mxu1 %v226_v30  ;;  %v316_v55 = vand.u32 127, %v126_v34 }
  0x4e   :  { %175 = vmatpush2.msra.mxu0 %v117_v57  ;;  %384 = vmatpush3.msra.mxu1 %v210_v31 }
  0x4f   :  { %176 = vmatprep.subr.mxu0 %v116_v59  ;;  %385 = vmatprep.subr.mxu1 %v225_v32  ;;  %v321_v56 = vand.u32 15, %v316_v55 }
  0x50   :  { %177 = vmatpush2.msra.mxu0 %v115_v61  ;;  %386 = vmatpush3.msra.mxu1 %v209_v33 }
  0x51   :  { %178 = vmatprep.subr.mxu0 %v114_v63  ;;  %vm329_vm0 = vcmp.ge.s32.totalorder %v321_v56, 8 }
  0x52   :  { %179 = vmatpush2.msra.mxu0 %v113_v1 }
  0x53   :  { %180 = vmatprep.subr.mxu0 %v112_v3 }
  0x54   :  { %181 = vmatpush2.msra.mxu0 %v111_v5 }
  0x55   :  { %182 = vmatprep.subr.mxu0 %v110_v7 }
  0x56   :  { %183 = vmatpush2.msra.mxu0 %v109_v8 }
  0x57   :  { %184 = vmatprep.subr.mxu0 %v108_v9 }
  0x58   :  { %185 = vmatpush2.msra.mxu0 %v107_v10 }
  0x59   :  { %186 = vmatprep.subr.mxu0 %v106_v11 }
  0x5a   :  { %187 = vmatpush2.msra.mxu0 %v105_v12 }
  0x5b   :  { %188 = vmatprep.subr.mxu0 %v104_v13 }
  0x5c   :  { %189 = vmatpush2.msra.mxu0 %v103_v14 }
  0x5d   :  { %190 = vmatprep.subr.mxu0 %v102_v15 }
  0x5e   :  { %191 = vmatpush2.msra.mxu0 %v101_v16 }
  0x5f   :  { %192 = vmatprep.subr.mxu0 %v100_v17 }
  0x60   :  { %193 = vmatpush2.msra.mxu0 %v99_v18 }
  0x61   :  { %194 = vmatprep.subr.mxu0 %v98_v19 }
  0x62   :  { %195 = vmatpush2.msra.mxu0 %v97_v20 }
  0x63   :  { %196 = vmatprep.subr.mxu0 %v96_v21 }
  0x64   :  { %197 = vmatpush2.msra.mxu0 %v95_v22 }
  0x65   :  { %198 = vmatprep.subr.mxu0 %v94_v23 }
  0x66   :  { %199 = vmatpush2.msra.mxu0 %v93_v24 }
  0x67   :  { %201 = vmatmul.mubr.f32.vlgmr.msra.gmra.mxu0 %v59_v25 }
 0x127   :  { %v202_v41 = vpop.f32.mrf.mxu0 }
 0x128   :  { %v203_v42 = vadd.f32 %v202_v41, %v129_v39 }
 0x129   :  { %v204_v43 = vpop.f32.mrf.mxu0 }
 0x12a   :  { %v205_v44 = vadd.f32 %v204_v43, %v133_v40  ;;  %v207_v46 = vmax.f32 %v203_v42, 0.0 }
 0x12c   :  { %v208_v45 = vmax.f32 %v205_v44, 0.0 }
 0x12e   :  { %309 = vmatprep.mubr.f32.mxu1 %v208_v45 }
 0x12f   :  { %310 = vmatmul.mubr.f32.vlgmr.msra.gmra.mxu1 %v207_v46 }
 0x1ef   :  { %v387_v47 = vpop.f32.mrf.mxu1 }
 0x1f1   :  { %v388_v49 = vpop.f32.mrf.mxu1 }
 0x1f2   :  { %v389_v50 = vadd.f32 %v388_v49, %v387_v47 }
 0x1f4   :  { %v312_v51 = vadd.f32 %v389_v50, %v354_v48 }
 0x1f6   :  { %v330_v52 = vmax.f32 %v312_v51, -20.0 }
 0x1f8   :  { %v331_v53 = vmin.f32 %v330_v52, 2.0 }
 0x1fa   :  { %v332_v54 = vmul.f32 1.442695, %v331_v53 }
 0x1fc   :  { %398 = vpow2.f32 %v332_v54 }
 0x209   :  { %v399_v57 = vpop.eup %398 }
 0x20a   :  { %v336_v58 = vsel %vm329_vm0, %v399_v57, %v312_v51 }
 0x20b   :  { %337 = vst [vmem:[#allocation8] sm:$0xff] %v336_v58 }
 0x20c   :  { %471 = shalt.err (!%p468_p5)
}
 0x20d   :  { %347 = dma.vmem_to_hbm [thread:$0]  %s345_s10, 128, %s541_s4, [#allocation4]  }
 0x20e   :  { %484 = dma.done.wait [#allocation4], 128  }
 0x20f   :  { %485 = vsyncadd [#allocation4], 4294967168 }
 0x210   :  { %351 = vsyncpa [#allocation3], 1 }
 0x211   :  { %352 = vsyncpa [#allocation6], 1 }
 0x212   :  { %353 = vsyncpa [#allocation4], 1 }

</bundles_post_ra>
